<compile_context>
chip_gen: v6e
topology: v6e:2x2x1
jax: 0.10.0
libtpu: 0.0.40
codegen_flags: <defaults>
</compile_context>

<pallas_src>
import functools
import math

import jax
import jax.numpy as jnp
from jax.experimental import pallas as pl
from jax.experimental.pallas import tpu as pltpu


# ----------------------------- kernel body ---------------------------------

def _peak_kernel(prms_ref, x_ref, o_ref, *, mins, maxs, model, approx):
    """Compute one (TP, TNx) tile of synthetic peak spectra.

    prms_ref: (TP, C) raw per-pixel parameters (clamped to [0, 1] here).
    x_ref:    (1, TNx) spectral-axis tile (broadcast over pixel rows).
    o_ref:    (TP, TNx) output spectra.
    """
    p = jnp.clip(prms_ref[...], 0.0, 1.0)           # torch.clamp(prms, 0, 1)
    x = x_ref[...]                                   # (1, TNx)

    def rng(name, col):
        lo = float(mins[name])
        hi = float(maxs[name])
        return lo + (hi - lo) * p[:, col:col + 1]    # (TP, 1)

    # ---- per-pixel (TP, 1) coefficient prep (cheap, off the hot path) ----
    area = rng('Area', 0)
    pos = rng('Position', 1)
    fwhm = rng('FWHM', 2)
    fwhm2 = fwhm * fwhm
    inv2f2 = 1.0 / (2.0 * fwhm2)                     # exact divide, (TP,1) only

    # NOTE: replicates PyTorch operator precedence exactly:
    #   ... + min_slope + (max_slope - min_slope) * p3 * x
    #       + min_int   + (max_int   - min_int)   * p4
    # i.e. min_slope is a constant additive offset, NOT multiplied by x.
    slope_x = (float(maxs['Slope']) - float(mins['Slope'])) * p[:, 3:4]
    const = (float(mins['Slope']) + float(mins['Intercept'])
             + (float(maxs['Intercept']) - float(mins['Intercept'])) * p[:, 4:5])

    if model == 'Gaussian':
        c_g = area
        c_l = None
    elif model == 'PseudoVoigt':
        frac = rng('Fraction', 5)
        c_g = frac * area
        c_l = (1.0 - frac) * area * (1.0 / math.pi) * fwhm
    else:
        raise ValueError(f'unknown model {model}')

    # ---- per-element (TP, TNx) hot path ----
    dx = x - pos
    dx2 = dx * dx                                    # shared by gauss/lorentz
    y = c_g * jnp.exp(-dx2 * inv2f2) + slope_x * x + const
    if c_l is not None:
        y = y + c_l * pl.reciprocal(dx2 + fwhm2, approx=approx)

    o_ref[...] = y.astype(o_ref.dtype)


# ----------------------------- tiling helper --------------------------------

def _divisors(n):
    ds = set()
    i = 1
    while i * i <= n:
        if n % i == 0:
            ds.add(i)
            ds.add(n // i)
        i += 1
    return sorted(ds)


def _choose_tiles(P, Nx, *, target_block_bytes=2 * 1024 * 1024,
                  max_tile_nx=2048):
    """Pick (tile_p, tile_nx) giving a ~target-sized, lane-dense output block."""
    # Spectral tile: full Nx when small, else largest 128-multiple divisor.
    if Nx <= max_tile_nx:
        tile_nx = Nx
    else:
        cands_nx = [d for d in _divisors(Nx) if d % 128 == 0 and d <= max_tile_nx]
        tile_nx = max(cands_nx) if cands_nx else Nx
    # Pixel tile: largest divisor of P (multiple of 8, or P itself) whose
    # (tile_p, tile_nx) f32 output block fits the per-buffer budget.
    max_rows = max(8, target_block_bytes // (tile_nx * 4))
    cands = [d for d in _divisors(P) if d % 8 == 0 or d == P]
    fitting = [d for d in cands if d <= max_rows]
    tile_p = max(fitting) if fitting else min(cands)
    # Prefer >= 2 total grid steps so both v7x TensorCores get work.
    if (P // tile_p) * (Nx // tile_nx) < 2:
        smaller = [d for d in cands if d <= max(P // 2, 1) and d < tile_p]
        if smaller:
            tile_p = max(smaller)
    return tile_p, tile_nx


# ----------------------------- entry point ----------------------------------

def peak_model_forward(prms_val, x, mins, maxs, model='Gaussian',
                       approx_reciprocal=True, out_dtype=jnp.float32,
                       tile_p=None, tile_nx=None):
    """prms_val: (nch, npix, npix) raw parameters; x: (Nx,) spectral axis."""
    nch, npix, _ = prms_val.shape
    P = npix * npix
    Nx = x.shape[0]

    # Plain-JAX glue (matches torch.reshape + transpose), plus lane padding of
    # the small channel axis to 8.
    prms2d = jnp.transpose(prms_val.reshape(nch, P), (1, 0)).astype(jnp.float32)
    c_pad = max(nch, 8)
    if c_pad != nch:
        prms2d = jnp.pad(prms2d, ((0, 0), (0, c_pad - nch)))
    x2d = x.reshape(1, Nx).astype(jnp.float32)

    auto_p, auto_nx = _choose_tiles(P, Nx)
    tile_p = auto_p if tile_p is None else tile_p
    tile_nx = auto_nx if tile_nx is None else tile_nx
    assert P % tile_p == 0 and Nx % tile_nx == 0

    # VMEM budget: double-buffered IO + headroom for block-sized intermediates.
    out_buf = tile_p * tile_nx * 4
    prm_buf = tile_p * 128 * 4         # channel axis lane-pads to 128 in VMEM
    x_buf = 8 * tile_nx * 4
    vmem_limit = int(min(48 * 1024 * 1024,
                         max(32 * 1024 * 1024,
                             2 * (out_buf + prm_buf + x_buf) + 8 * out_buf)))

    kernel = functools.partial(_peak_kernel, mins=mins, maxs=maxs,
                               model=model, approx=approx_reciprocal)

    return pl.pallas_call(
        kernel,
        out_shape=jax.ShapeDtypeStruct((P, Nx), out_dtype),
        grid_spec=pltpu.PrefetchScalarGridSpec(
            num_scalar_prefetch=0,
            grid=(P // tile_p, Nx // tile_nx),
            in_specs=[
                pl.BlockSpec((tile_p, c_pad), lambda i, j: (i, 0)),
                pl.BlockSpec((1, tile_nx), lambda i, j: (0, j)),
            ],
            out_specs=pl.BlockSpec((tile_p, tile_nx), lambda i, j: (i, j)),
        ),
        compiler_params=pltpu.CompilerParams(
            dimension_semantics=('parallel', 'parallel'),
            vmem_limit_bytes=vmem_limit),
    )(prms2d, x2d)


# ----------------------------- reference ------------------------------------

def peak_model_reference(prms_val, x, mins, maxs, model='Gaussian'):
    """Pure-jnp reference mirroring the PyTorch forward exactly."""
    nch, npix, _ = prms_val.shape
    P = npix * npix
    p = jnp.clip(jnp.transpose(prms_val.reshape(nch, P), (1, 0)), 0.0, 1.0)
    x = x.astype(jnp.float32)

    def rng(name, col):
        return mins[name] + (maxs[name] - mins[name]) * p[:, col:col + 1]

    area, pos, fwhm = rng('Area', 0), rng('Position', 1), rng('FWHM', 2)
    gauss = area * jnp.exp(-(x - pos) ** 2 / (2.0 * fwhm ** 2))
    tail = (mins['Slope'] + (maxs['Slope'] - mins['Slope']) * p[:, 3:4] * x
            + mins['Intercept']
            + (maxs['Intercept'] - mins['Intercept']) * p[:, 4:5])
    if model == 'Gaussian':
        return gauss + tail
    frac = rng('Fraction', 5)
    lorentz = (area / jnp.pi) * (fwhm / ((x - pos) ** 2 + fwhm ** 2))
    return frac * gauss + (1.0 - frac) * lorentz + tail


# ----------------------------- self-test -------------------------------------

if __name__ == '__main__':
    key = jax.random.PRNGKey(0)
    k1, _ = jax.random.split(key)

    nch, npix, Nx = 6, 16, 256          # P = npix*npix = 256 pixels
    # Raw parameters outside [0,1] so the clamp is exercised.
    prms_val = jax.random.uniform(k1, (nch, npix, npix),
                                  dtype=jnp.float32, minval=-0.2, maxval=1.2)
    x = jnp.arange(Nx, dtype=jnp.float32)

    mins = {'Area': 0.0, 'Position': 50.0, 'FWHM': 1.0,
            'Slope': -0.1, 'Intercept': 0.0, 'Fraction': 0.0}
    maxs = {'Area': 10.0, 'Position': 200.0, 'FWHM': 20.0,
            'Slope': 0.1, 'Intercept': 1.0, 'Fraction': 1.0}

    for model in ('Gaussian', 'PseudoVoigt'):
        y_ref = peak_model_reference(prms_val, x, mins, maxs, model=model)

        # Exact-reciprocal path: tight correctness check against the reference.
        y = jax.block_until_ready(
            peak_model_forward(prms_val, x, mins, maxs, model=model,
                               approx_reciprocal=False))
        assert y.shape == (npix * npix, Nx)
        assert jnp.allclose(y, y_ref, atol=1e-4, rtol=1e-4), model

        # Fast path (approx EUP reciprocal; only differs for PseudoVoigt).
        y_fast = jax.block_until_ready(
            peak_model_forward(prms_val, x, mins, maxs, model=model,
                               approx_reciprocal=True))
        assert jnp.allclose(y_fast, y_ref, atol=5e-2, rtol=5e-3), model

    print("KERNEL_OK")
</pallas_src>

<mosaic_0001>
module attributes {stable_mosaic.version = 11 : i64} {
  func.func @_peak_kernel(%arg0: i32, %arg1: i32, %arg2: memref<128x8xf32, #tpu.memory_space<vmem>>, %arg3: memref<1x256xf32, #tpu.memory_space<vmem>>, %arg4: memref<128x256xf32, #tpu.memory_space<vmem>>) attributes {dimension_semantics = [#tpu.dimension_semantics<parallel>, #tpu.dimension_semantics<parallel>], iteration_bounds = array<i64: 2, 1>, scalar_prefetch = 0 : i64, scratch_operands = 0 : i64, tpu.core_type = #tpu.core_type<tc>, window_params = [{transform_indices = @transform_0, window_bounds = array<i64: 128, 8>}, {transform_indices = @transform_1, window_bounds = array<i64: 1, 256>}, {transform_indices = @transform_2, window_bounds = array<i64: 128, 256>}]} {
    %c0 = arith.constant 0 : index
    %c0_0 = arith.constant 0 : index
    %0 = vector.load %arg2[%c0, %c0_0] : memref<128x8xf32, #tpu.memory_space<vmem>>, vector<128x8xf32>
    %cst = arith.constant 0.000000e+00 : f32
    %cst_1 = arith.constant 1.000000e+00 : f32
    %1 = vector.broadcast %cst : f32 to vector<128x8xf32>
    %2 = arith.maximumf %1, %0 : vector<128x8xf32>
    %3 = vector.broadcast %cst_1 : f32 to vector<128x8xf32>
    %4 = arith.minimumf %3, %2 : vector<128x8xf32>
    %c0_2 = arith.constant 0 : index
    %c0_3 = arith.constant 0 : index
    %5 = vector.load %arg3[%c0_2, %c0_3] : memref<1x256xf32, #tpu.memory_space<vmem>>, vector<1x256xf32>
    %6 = vector.extract_strided_slice %4 {offsets = [0, 0], sizes = [128, 1], strides = [1, 1]} : vector<128x8xf32> to vector<128x1xf32>
    %cst_4 = arith.constant 1.000000e+01 : f32
    %7 = vector.broadcast %cst_4 : f32 to vector<128x1xf32>
    %8 = arith.mulf %7, %6 : vector<128x1xf32>
    %cst_5 = arith.constant 0.000000e+00 : f32
    %9 = vector.broadcast %cst_5 : f32 to vector<128x1xf32>
    %10 = arith.addf %9, %8 : vector<128x1xf32>
    %11 = vector.extract_strided_slice %4 {offsets = [0, 1], sizes = [128, 1], strides = [1, 1]} : vector<128x8xf32> to vector<128x1xf32>
    %cst_6 = arith.constant 1.500000e+02 : f32
    %12 = vector.broadcast %cst_6 : f32 to vector<128x1xf32>
    %13 = arith.mulf %12, %11 : vector<128x1xf32>
    %cst_7 = arith.constant 5.000000e+01 : f32
    %14 = vector.broadcast %cst_7 : f32 to vector<128x1xf32>
    %15 = arith.addf %14, %13 : vector<128x1xf32>
    %16 = vector.extract_strided_slice %4 {offsets = [0, 2], sizes = [128, 1], strides = [1, 1]} : vector<128x8xf32> to vector<128x1xf32>
    %cst_8 = arith.constant 1.900000e+01 : f32
    %17 = vector.broadcast %cst_8 : f32 to vector<128x1xf32>
    %18 = arith.mulf %17, %16 : vector<128x1xf32>
    %cst_9 = arith.constant 1.000000e+00 : f32
    %19 = vector.broadcast %cst_9 : f32 to vector<128x1xf32>
    %20 = arith.addf %19, %18 : vector<128x1xf32>
    %21 = arith.mulf %20, %20 : vector<128x1xf32>
    %cst_10 = arith.constant 2.000000e+00 : f32
    %22 = vector.broadcast %cst_10 : f32 to vector<128x1xf32>
    %23 = arith.mulf %22, %21 : vector<128x1xf32>
    %cst_11 = arith.constant 1.000000e+00 : f32
    %24 = vector.broadcast %cst_11 : f32 to vector<128x1xf32>
    %25 = arith.divf %24, %23 : vector<128x1xf32>
    %26 = vector.extract_strided_slice %4 {offsets = [0, 3], sizes = [128, 1], strides = [1, 1]} : vector<128x8xf32> to vector<128x1xf32>
    %cst_12 = arith.constant 2.000000e-01 : f32
    %27 = vector.broadcast %cst_12 : f32 to vector<128x1xf32>
    %28 = arith.mulf %27, %26 : vector<128x1xf32>
    %29 = vector.extract_strided_slice %4 {offsets = [0, 4], sizes = [128, 1], strides = [1, 1]} : vector<128x8xf32> to vector<128x1xf32>
    %cst_13 = arith.constant 1.000000e+00 : f32
    %30 = vector.broadcast %cst_13 : f32 to vector<128x1xf32>
    %31 = arith.mulf %30, %29 : vector<128x1xf32>
    %cst_14 = arith.constant -1.000000e-01 : f32
    %32 = vector.broadcast %cst_14 : f32 to vector<128x1xf32>
    %33 = arith.addf %32, %31 : vector<128x1xf32>
    %34 = vector.broadcast %5 : vector<1x256xf32> to vector<128x256xf32>
    %35 = vector.broadcast %15 : vector<128x1xf32> to vector<128x256xf32>
    %36 = arith.subf %34, %35 : vector<128x256xf32>
    %37 = arith.mulf %36, %36 : vector<128x256xf32>
    %cst_15 = arith.constant 0.000000e+00 : f32
    %38 = vector.broadcast %cst_15 : f32 to vector<128x256xf32>
    %39 = arith.subf %38, %37 : vector<128x256xf32>
    %40 = vector.broadcast %25 : vector<128x1xf32> to vector<128x256xf32>
    %41 = arith.mulf %39, %40 : vector<128x256xf32>
    %42 = math.exp %41 : vector<128x256xf32>
    %43 = vector.broadcast %10 : vector<128x1xf32> to vector<128x256xf32>
    %44 = arith.mulf %43, %42 : vector<128x256xf32>
    %45 = vector.broadcast %28 : vector<128x1xf32> to vector<128x256xf32>
    %46 = vector.broadcast %5 : vector<1x256xf32> to vector<128x256xf32>
    %47 = arith.mulf %45, %46 : vector<128x256xf32>
    %48 = arith.addf %44, %47 : vector<128x256xf32>
    %49 = vector.broadcast %33 : vector<128x1xf32> to vector<128x256xf32>
    %50 = arith.addf %48, %49 : vector<128x256xf32>
    %c0_16 = arith.constant 0 : index
    %c0_17 = arith.constant 0 : index
    %51 = vector.load %arg4[%c0_16, %c0_17] : memref<128x256xf32, #tpu.memory_space<vmem>>, vector<128x256xf32>
    tpu.vector_store %arg4[%c0_16, %c0_17], %50 {strides = array<i32>} : memref<128x256xf32, #tpu.memory_space<vmem>>, vector<128x256xf32>,
    return
  }
  func.func @transform_0(%arg0: i32, %arg1: i32) -> (i32, i32) {
    %c0_i32 = arith.constant 0 : i32
    %c0_i32_0 = arith.constant 0 : i32
    return %arg0, %c0_i32 : i32, i32
  }
  func.func @transform_1(%arg0: i32, %arg1: i32) -> (i32, i32) {
    %c0_i32 = arith.constant 0 : i32
    %c0_i32_0 = arith.constant 0 : i32
    return %c0_i32, %arg1 : i32, i32
  }
  func.func @transform_2(%arg0: i32, %arg1: i32) -> (i32, i32) {
    %c0_i32 = arith.constant 0 : i32
    return %arg0, %arg1 : i32, i32
  }
}

</mosaic_0001>

<bundles_post_ra>
// kernel: tpu_custom_call.1
= control target key start
LH: loop header
LB: loop body
LE: loop exit
PB: predicated region body
PF: predicated region fallthrough
CT: control target
= control target key end

     0   :  { %7 = vsyncpa [#allocation3], 0  ;;  %s2171_s0 = inlined_call_operand.vmem [shape: f32[256,8], index: 0, kind: input, shape index: {}]   ;;  %s2172_s1 = inlined_call_operand.vmem [shape: f32[1,256], index: 1, kind: input, shape index: {}]   ;;  %s2173_s2 = inlined_call_operand.hbm [shape: f32[256,256], index: 2, kind: output, shape index: {}]  }
   0x1   :  { %9 = vsyncpa [#allocation3 + $0x1], 0  ;;  %s1571_s9 = smov 0   ;;  %s1573_s10 = smov 0  }
   0x2   :  { %s1575_s11 = smov 0   ;;  %s1577_s12 = smov 0  }
   0x3   :  { %s1579_s13 = smov 0   ;;  %s1581_s14 = smov 0  }
   0x4 LB: > { %s1285_s15 = sadd.s32 4294967295, %s1546_s14   ;;  %s1286_s16 = sadd.s32 4294967294, %s1546_s14   ;;  %s1546_s14 = sphi %s1581_s14, %s15_s14   ;;  %s1542_s13 = sphi %s1579_s13, %s2180_s13   ;;  %s1538_s12 = sphi %s1577_s12, %s2179_s12   ;;  %s1534_s11 = sphi %s1575_s11, %s2178_s11   ;;  %s1530_s10 = sphi %s1573_s10, %s2177_s10   ;;  %s1526_s9 = sphi %s1571_s9, %s2176_s9  }
   0x5   : > { %s27_s17 = sadd.s32 1, %s1542_s13  ;;  %s88_s18 = sadd.s32 1, %s1534_s11 }
   0x6   : > { %p29_p0 = scmp.ge.s32.totalorder %s27_s17, 2  ;;  %p98_p1 = scmp.ne.s32.totalorder %s1534_s11, %s1530_s10 }
   0x7   : > { %p99_p2 = scmp.eq.s32.totalorder %s1285_s15, 1  ;;  %p104_p3 = scmp.ne.s32.totalorder %s1530_s10, %s1526_s9 }
   0x8   : > { %s2182_s17 = smov (%p29_p0, %s27_s17), 0  ;;  %p105_p5 = scmp.eq.s32.totalorder %s1286_s16, 1 }
   0x9   : > { %p1611_p4 = por %p99_p2, %p98_p1  ;;  %s83_s20 = ssub.s32 %s1542_s13, %s2182_s17 }
   0xa   : > { %p1290_p6 = scmp.ge.s32.totalorder %s1546_s14, 1  ;;  %p86_p7 = scmp.eq.s32.totalorder %s83_s20, 0 }
   0xb   : > { %p1618_p8 = por %p105_p5, %p104_p3  ;;  %p140_p9 = scmp.lt.s32.totalorder %s1546_s14, 3 }
   0xc   : > { %s1624_s22 = scalar_select %p86_p7, %s1534_s11, %s88_s18  }
   0xd   : > { %p141_p10 = pnand %p1290_p6, %p140_p9 }
   0xe   : > { %s1292_s23 = sshll.u32 (!%p141_p10), %s1538_s12, 4  ;;  %s163_s30 = sand.u32 (!%p141_p10), 1, %s1530_s10  }
   0xf   : > { %144 = sbr.rel (%p141_p10) target bundleno = 340 (0x154), region = 28  ;;  %p167_p11 = scmp.lt.s32.totalorder (!%p141_p10), %s1292_s23, 31 }
  0x10   : > { %s1291_s3 = sshll.u32 (!%p141_p10), %s163_s30, 8  ;;  %s1301_s5 = sshll.u32 (!%p141_p10), %s1538_s12, 12 }
  0x11   : > { %s2003_s4 = scalar_lea.vmem (!%p141_p10), [#allocation2], %s1291_s3  ;;  %s2118_s15 = scalar_lea.hbm (!%p141_p10), %s2173_s2, %s1301_s5 }
  0x12   : > { %s1200_s6 = sshll.u32 (!%p141_p10), %s2003_s4, 4  ;;  %s2126_s12 = scalar_lea.sflag (!%p141_p10), [#allocation3], %s163_s30  ;;  %s2120_s6 = int_to_ptr.vmem [resolvable:$true] %s1200_s6 }
  0x13   : > { %s1470_s16 = scalar_lea.vmem (!%p141_p10), %s2120_s6, 4096  ;;  %s1553_s18 = smov (!%p141_p10), [#allocation2]  }
  0x14   : > { %v1548_v0 = vmov 1   ;;  %s2184_s23 = smov (!%p167_p11, %s1292_s23), 31  ;;  %p1471_p12 = scmp.ne.s32.totalorder %s2120_s6, %s1470_s16 }
  0x15   : > { %1365 = vset.pattern.permute.xlu1 %v1548_v0  ;;  %1364 = vset.pattern.permute.xlu0 %v1548_v0  ;;  %s1293_s24 = sshll.u32 %s2184_s23, 3  ;;  %s1474_s20 = sshll.u32 %s1553_s18, 4  ;;  %s1475_s20 = int_to_ptr.vmem [resolvable:$false] %s1474_s20 }
  0x16   : > { %s1630_s27 = scalar_lea.vmem %s2171_s0, %s1293_s24  ;;  %p1472_p13 = pnand %p1471_p12, %p1611_p4 }
  0x17   : > { %v181_v1 = vld [vmem:[%s1630_s27 + $0x10] sm:$0xff]  ;;  %v179_v2 = vld [vmem:[%s1630_s27] sm:$0xff]  ;;  %v182_v3 = vld [vmem:[%s1630_s27 + $0x18] sm:$0xff]  ;;  %s1476_s23 = scalar_lea.vmem %s1475_s20, 8192  ;;  %p1477_p1 = scmp.lt.s32.totalorder %s2120_s6, %s1475_s20 }
  0x18   : > { %v197_v4 = vmax.f32 %v181_v1, 0.0  ;;  %v195_v5 = vmax.f32 %v179_v2, 0.0  ;;  %v198_v6 = vmax.f32 %v182_v3, 0.0  ;;  %v180_v7 = vld [vmem:[%s1630_s27 + $0x8] sm:$0xff]  ;;  %v183_v9 = vld [vmem:[%s1630_s27 + $0x20] sm:$0xff]  ;;  %v186_v20 = vld [vmem:[%s1630_s27 + $0x38] sm:$0xff]  ;;  %p1473_p0 = pneg %p1472_p13  ;;  %p1478_p2 = scmp.lt.s32.totalorder %s1476_s23, %s1470_s16 }
  0x19   : > { %v184_v8 = vld [vmem:[%s1630_s27 + $0x28] sm:$0xff]  ;;  %v196_v10 = vmax.f32 %v180_v7, 0.0  ;;  %v199_v12 = vmax.f32 %v183_v9, 0.0  ;;  %v185_v24 = vld [vmem:[%s1630_s27 + $0x30] sm:$0xff]  ;;  %v202_v29 = vmax.f32 %v186_v20, 0.0  ;;  %v187_v38 = vld [vmem:[%s1630_s27 + $0x40] sm:$0xff] }
  0x1a   : > { %v200_v11 = vmax.f32 %v184_v8, 0.0  ;;  %v1638_v13 = vmin.f32 %v197_v4, 1.0  ;;  %v1640_v14 = vmin.f32 %v195_v5, 1.0  ;;  %v1642_v15 = vmin.f32 %v198_v6, 1.0  ;;  %v188_v37 = vld [vmem:[%s1630_s27 + $0x48] sm:$0xff]  ;;  %v190_v48 = vld [vmem:[%s1630_s27 + $0x58] sm:$0xff]  ;;  %p1479_p3 = por %p1478_p2, %p1477_p1 }
  0x1b   : > { %v1644_v16 = vmin.f32 %v196_v10, 1.0  ;;  %v1653_v23 = vmin.f32 %v199_v12, 1.0  ;;  %v201_v33 = vmax.f32 %v185_v24, 0.0  ;;  %v1664_v43 = vmin.f32 %v202_v29, 1.0  ;;  %v189_v55 = vld [vmem:[%s1630_s27 + $0x50] sm:$0xff]  ;;  %v192_v4 = vld [vmem:[%s1630_s27 + $0x68] sm:$0xff] }
  0x1c   : > { %v262_v17 = vmul.f32 150.0, %v1638_v13  ;;  %v260_v18 = vmul.f32 150.0, %v1640_v14  ;;  %v1648_v19 = vmin.f32 %v200_v11, 1.0  ;;  %v263_v21 = vmul.f32 150.0, %v1642_v15  ;;  %v191_v6 = vld [vmem:[%s1630_s27 + $0x60] sm:$0xff]  ;;  %v194_v20 = vld [vmem:[%s1630_s27 + $0x78] sm:$0xff]  ;;  %p1480_p5 = pnand %p1479_p3, %p1473_p0 }
  0x1d   : > { %v261_v22 = vmul.f32 150.0, %v1644_v16  ;;  %v294_v27 = vmul.f32 19.0, %v1638_v13  ;;  %v292_v28 = vmul.f32 19.0, %v1640_v14  ;;  %v295_v34 = vmul.f32 19.0, %v1642_v15 }
  0x1e   : > { %v278_v25 = vadd.f32 50.0, %v262_v17  ;;  %v276_v26 = vadd.f32 50.0, %v260_v18  ;;  %v279_v30 = vadd.f32 50.0, %v263_v21  ;;  %v265_v32 = vmul.f32 150.0, %v1648_v19 }
  0x1f   : > { %v277_v31 = vadd.f32 50.0, %v261_v22  ;;  %v264_v35 = vmul.f32 150.0, %v1653_v23  ;;  %v293_v36 = vmul.f32 19.0, %v1644_v16  ;;  %v310_v39 = vadd.f32 1.0, %v294_v27 }
  0x20   : > { %443 = vperm.xlu1 %1365, %v278_v25   ;;  %433 = vperm.xlu0 %1364, %v276_v26   ;;  %v308_v40 = vadd.f32 1.0, %v292_v28  ;;  %v281_v41 = vadd.f32 50.0, %v265_v32  ;;  %v1666_v44 = vmin.f32 %v201_v33, 1.0  ;;  %v311_v45 = vadd.f32 1.0, %v295_v34  ;;  %v193_v34 = vld [vmem:[%s1630_s27 + $0x70] sm:$0xff] }
  0x21   : > { %v280_v42 = vadd.f32 50.0, %v264_v35  ;;  %v204_v46 = vmax.f32 %v188_v37, 0.0  ;;  %v203_v47 = vmax.f32 %v187_v38, 0.0  ;;  %v309_v49 = vadd.f32 1.0, %v293_v36 }
  0x22   : > { %v267_v50 = vmul.f32 150.0, %v1664_v43  ;;  %v266_v51 = vmul.f32 150.0, %v1666_v44  ;;  %v326_v52 = vmul.f32 %v310_v39, %v310_v39  ;;  %v324_v56 = vmul.f32 %v308_v40, %v308_v40 }
  0x23   : > { %v1671_v53 = vmin.f32 %v204_v46, 1.0  ;;  %v1673_v54 = vmin.f32 %v203_v47, 1.0  ;;  %v206_v59 = vmax.f32 %v190_v48, 0.0  ;;  %v327_v60 = vmul.f32 %v311_v45, %v311_v45 }
  0x24   : > { %448 = vperm.xlu1 %1365, %v279_v30   ;;  %438 = vperm.xlu0 %1364, %v277_v31   ;;  %v283_v57 = vadd.f32 50.0, %v267_v50  ;;  %v282_v58 = vadd.f32 50.0, %v266_v51  ;;  %v297_v61 = vmul.f32 19.0, %v1648_v19  ;;  %v325_v0 = vmul.f32 %v309_v49, %v309_v49 }
  0x25   : > { %v269_v62 = vmul.f32 150.0, %v1671_v53  ;;  %v268_v63 = vmul.f32 150.0, %v1673_v54  ;;  %v296_v1 = vmul.f32 19.0, %v1653_v23  ;;  %v1680_v2 = vmin.f32 %v206_v59, 1.0 }
  0x26   : > { %v205_v3 = vmax.f32 %v189_v55, 0.0  ;;  %v299_v5 = vmul.f32 19.0, %v1664_v43  ;;  %v342_v7 = vmul.f32 2.0, %v326_v52  ;;  %v340_v11 = vmul.f32 2.0, %v324_v56 }
  0x27   : > { %v285_v8 = vadd.f32 50.0, %v269_v62  ;;  %v284_v9 = vadd.f32 50.0, %v268_v63  ;;  %v271_v10 = vmul.f32 150.0, %v1680_v2  ;;  %v313_v12 = vadd.f32 1.0, %v297_v61 }
  0x28   : > { %458 = vperm.xlu1 %1365, %v281_v41   ;;  %453 = vperm.xlu0 %1364, %v280_v42   ;;  %v1686_v17 = vmin.f32 %v205_v3, 1.0  ;;  %v208_v18 = vmax.f32 %v192_v4, 0.0  ;;  %v343_v21 = vmul.f32 2.0, %v327_v60  ;;  %v341_v22 = vmul.f32 2.0, %v325_v0 }
  0x29   : > { %v312_v24 = vadd.f32 1.0, %v296_v1  ;;  %v207_v25 = vmax.f32 %v191_v6, 0.0  ;;  %v315_v26 = vadd.f32 1.0, %v299_v5  ;;  %v298_v27 = vmul.f32 19.0, %v1666_v44 }
  0x2a   : > { %v270_v28 = vmul.f32 150.0, %v1686_v17  ;;  %v1691_v29 = vmin.f32 %v208_v18, 1.0  ;;  %v301_v30 = vmul.f32 19.0, %v1671_v53  ;;  %v287_v31 = vadd.f32 50.0, %v271_v10 }
  0x2b   : > { %v1694_v32 = vmin.f32 %v207_v25, 1.0  ;;  %v210_v33 = vmax.f32 %v194_v20, 0.0  ;;  %1374 = vrcp.f32 %v340_v11  ;;  %v329_v35 = vmul.f32 %v313_v12, %v313_v12 }
  0x2c   : > { %468 = vperm.xlu1 %1365, %v283_v57   ;;  %463 = vperm.xlu0 %1364, %v282_v58   ;;  %v286_v36 = vadd.f32 50.0, %v270_v28  ;;  %v273_v37 = vmul.f32 150.0, %v1691_v29  ;;  %1376 = vrcp.f32 %v342_v7  ;;  %v300_v38 = vmul.f32 19.0, %v1673_v54 }
  0x2d   : > { %v272_v39 = vmul.f32 150.0, %v1694_v32  ;;  %v1700_v40 = vmin.f32 %v210_v33, 1.0  ;;  %v328_v41 = vmul.f32 %v312_v24, %v312_v24  ;;  %v331_v42 = vmul.f32 %v315_v26, %v315_v26 }
  0x2e   : > { %v314_v45 = vadd.f32 1.0, %v298_v27  ;;  %v209_v46 = vmax.f32 %v193_v34, 0.0  ;;  %v317_v47 = vadd.f32 1.0, %v301_v30  ;;  %v289_v48 = vadd.f32 50.0, %v273_v37 }
  0x2f   : > { %v288_v49 = vadd.f32 50.0, %v272_v39  ;;  %v275_v50 = vmul.f32 150.0, %v1700_v40  ;;  %v345_v51 = vmul.f32 2.0, %v329_v35  ;;  %v303_v52 = vmul.f32 19.0, %v1680_v2 }
  0x30   : > { %478 = vperm.xlu1 %1365, %v285_v8   ;;  %473 = vperm.xlu0 %1364, %v284_v9   ;;  %v1704_v55 = vmin.f32 %v209_v46, 1.0  ;;  %1378 = vrcp.f32 %v341_v22  ;;  %v316_v56 = vadd.f32 1.0, %v300_v38  ;;  %v344_v57 = vmul.f32 2.0, %v328_v41 }
  0x31   : > { %1380 = vrcp.f32 %v343_v21  ;;  %v330_v58 = vmul.f32 %v314_v45, %v314_v45  ;;  %v302_v59 = vmul.f32 19.0, %v1686_v17  ;;  %v347_v61 = vmul.f32 2.0, %v331_v42 }
  0x32   : > { %v274_v60 = vmul.f32 150.0, %v1704_v55  ;;  %v333_v62 = vmul.f32 %v317_v47, %v317_v47  ;;  %v291_v63 = vadd.f32 50.0, %v275_v50  ;;  %v319_v0 = vadd.f32 1.0, %v303_v52 }
  0x33   : > { %v305_v1 = vmul.f32 19.0, %v1691_v29  ;;  %1382 = vrcp.f32 %v345_v51  ;;  %v332_v4 = vmul.f32 %v316_v56, %v316_v56  ;;  %v346_v5 = vmul.f32 2.0, %v330_v58 }
  0x34   : > { %488 = vperm.xlu1 %1365, %v287_v31   ;;  %483 = vperm.xlu0 %1364, %v286_v36   ;;  %v290_v3 = vadd.f32 50.0, %v274_v60  ;;  %v318_v6 = vadd.f32 1.0, %v302_v59  ;;  %v304_v7 = vmul.f32 19.0, %v1694_v32  ;;  %1384 = vrcp.f32 %v344_v57 }
  0x35   : > { %v349_v8 = vmul.f32 2.0, %v333_v62  ;;  %v335_v9 = vmul.f32 %v319_v0, %v319_v0  ;;  %v321_v10 = vadd.f32 1.0, %v305_v1  ;;  %v307_v11 = vmul.f32 19.0, %v1700_v40 }
  0x36   : > { %1386 = vrcp.f32 %v347_v61  ;;  %v348_v18 = vmul.f32 2.0, %v332_v4  ;;  %v334_v21 = vmul.f32 %v318_v6, %v318_v6  ;;  %v320_v22 = vadd.f32 1.0, %v304_v7 }
  0x37   : > { %v306_v24 = vmul.f32 19.0, %v1704_v55  ;;  %1388 = vrcp.f32 %v346_v5  ;;  %v1549_v25 = vmov 2   ;;  %v351_v26 = vmul.f32 2.0, %v335_v9 }
  0x38   : > { %498 = vperm.xlu1 %1365, %v289_v48   ;;  %493 = vperm.xlu0 %1364, %v288_v49   ;;  %v1375_v12 = vpop.eup %1374  ;;  %v337_v27 = vmul.f32 %v321_v10, %v321_v10  ;;  %v323_v28 = vadd.f32 1.0, %v307_v11  ;;  %1390 = vrcp.f32 %v349_v8  ;;  %v350_v33 = vmul.f32 2.0, %v334_v21 }
  0x39   : > { %v1377_v20 = vpop.eup %1376  ;;  %v336_v34 = vmul.f32 %v320_v22, %v320_v22  ;;  %v322_v35 = vadd.f32 1.0, %v306_v24  ;;  %1392 = vrcp.f32 %v348_v18  ;;  %v229_v60 = vmul.f32 10.0, %v1644_v16 }
  0x3a   : > { %v353_v36 = vmul.f32 2.0, %v337_v27  ;;  %v339_v37 = vmul.f32 %v323_v28, %v323_v28  ;;  %1394 = vrcp.f32 %v351_v26  ;;  %v228_v61 = vmul.f32 10.0, %v1640_v14 }
  0x3b   : > { %v352_v39 = vmul.f32 2.0, %v336_v34  ;;  %v338_v41 = vmul.f32 %v322_v35, %v322_v35  ;;  %1396 = vrcp.f32 %v350_v33  ;;  %v1550_v62 = vmov 0  }
  0x3c   : > { %508 = vperm.xlu1 %1365, %v291_v63   ;;  %503 = vperm.xlu0 %1364, %v290_v3   ;;  %v355_v45 = vmul.f32 2.0, %v339_v37  ;;  %1398 = vrcp.f32 %v353_v36  ;;  %v232_v63 = vmul.f32 10.0, %v1653_v23  ;;  %v230_v0 = vmul.f32 10.0, %v1638_v13 }
  0x3d   : > { %v1379_v30 = vpop.eup %1378  ;;  %v354_v47 = vmul.f32 2.0, %v338_v41  ;;  %1400 = vrcp.f32 %v352_v39  ;;  %v234_v1 = vmul.f32 10.0, %v1666_v44  ;;  %v231_v3 = vmul.f32 10.0, %v1642_v15 }
  0x3e   : > { %v1381_v31 = vpop.eup %1380  ;;  %1402 = vrcp.f32 %v355_v45  ;;  %v236_v4 = vmul.f32 10.0, %v1673_v54  ;;  %v233_v5 = vmul.f32 10.0, %v1648_v19  ;;  %v238_v6 = vmul.f32 10.0, %v1686_v17 }
  0x3f   : > { %1404 = vrcp.f32 %v354_v47  ;;  %v235_v7 = vmul.f32 10.0, %v1664_v43  ;;  %v240_v8 = vmul.f32 10.0, %v1694_v32  ;;  %v237_v9 = vmul.f32 10.0, %v1671_v53 }
  0x40   : > { %1367 = vset.pattern.permute.xlu1 %v1549_v25  ;;  %1366 = vset.pattern.permute.xlu0 %v1549_v25  ;;  %v1383_v38 = vpop.eup %1382  ;;  %v242_v10 = vmul.f32 10.0, %v1704_v55  ;;  %v239_v11 = vmul.f32 10.0, %v1680_v2  ;;  %v241_v18 = vmul.f32 10.0, %v1691_v29  ;;  %v391_v21 = vmul.f32 0.2, %v1642_v15 }
  0x41   : > { %609 = vperm.xlu0 %1366, %v1375_v12   ;;  %614 = vperm.xlu1 %1367, %v1379_v30   ;;  %v1385_v42 = vpop.eup %1384  ;;  %v388_v12 = vmul.f32 0.2, %v1640_v14  ;;  %v243_v22 = vmul.f32 10.0, %v1700_v40  ;;  %v393_v24 = vmul.f32 0.2, %v1648_v19 }
  0x42   : > { %v389_v25 = vmul.f32 0.2, %v1644_v16  ;;  %v395_v26 = vmul.f32 0.2, %v1664_v43  ;;  %v390_v27 = vmul.f32 0.2, %v1638_v13 }
  0x43   : > { %v1387_v46 = vpop.eup %1386  ;;  %v397_v28 = vmul.f32 0.2, %v1671_v53  ;;  %v392_v30 = vmul.f32 0.2, %v1653_v23  ;;  %v394_v33 = vmul.f32 0.2, %v1666_v44 }
  0x44   : > { %v1389_v48 = vpop.eup %1388  ;;  %v401_v34 = vmul.f32 0.2, %v1691_v29  ;;  %v396_v35 = vmul.f32 0.2, %v1673_v54  ;;  %v403_v36 = vmul.f32 0.2, %v1700_v40 }
  0x45   : > { %624 = vperm.xlu0 %1366, %v1381_v31   ;;  %619 = vperm.xlu1 %1367, %v1377_v20   ;;  %v1391_v49 = vpop.eup %1390  ;;  %v1551_v20 = vmov 3   ;;  %v399_v31 = vmul.f32 0.2, %v1680_v2  ;;  %v398_v37 = vmul.f32 0.2, %v1686_v17 }
  0x46   : > { %v1393_v50 = vpop.eup %1392  ;;  %v405_v41 = vadd.f32 -0.1, %v1644_v16  ;;  %v404_v16 = vadd.f32 -0.1, %v1640_v14  ;;  %v227_v14 = vld [vmem:[%s2172_s1] sm:$0x3] }
  0x47   : > { %v1395_v51 = vpop.eup %1394 }
  0x48   : > { %v1397_v52 = vpop.eup %1396 }
  0x49   : > { %634 = vperm.xlu0 %1366, %v1383_v38   ;;  %629 = vperm.xlu1 %1367, %v1385_v42   ;;  %v1399_v56 = vpop.eup %1398  ;;  %v400_v42 = vmul.f32 0.2, %v1694_v32 }
  0x4a   : > { %v1401_v57 = vpop.eup %1400 }
  0x4b   : > { %v1403_v58 = vpop.eup %1402 }
  0x4c   : > { %v1405_v59 = vpop.eup %1404 }
  0x4d   : > { %644 = vperm.xlu0 %1366, %v1387_v46   ;;  %639 = vperm.xlu1 %1367, %v1389_v48   ;;  %v1552_v46 = vmov 4   ;;  %v408_v48 = vadd.f32 -0.1, %v1653_v23  ;;  %v412_v23 = vadd.f32 -0.1, %v1673_v54 }
  0x4e   : > { %v407_v54 = vadd.f32 -0.1, %v1642_v15 }
  0x51   : > { %654 = vperm.xlu0 %1366, %v1391_v49   ;;  %649 = vperm.xlu1 %1367, %v1393_v50   ;;  %v402_v49 = vmul.f32 0.2, %v1704_v55  ;;  %v421_v50 = vlaneseq }
  0x55   : > { %664 = vperm.xlu0 %1366, %v1395_v51   ;;  %659 = vperm.xlu1 %1367, %v1397_v52  }
  0x59   : > { %674 = vperm.xlu0 %1366, %v1399_v56   ;;  %669 = vperm.xlu1 %1367, %v1401_v57   ;;  %v410_v56 = vadd.f32 -0.1, %v1666_v44  ;;  %v422_v57 = vshrl.u32 %v421_v50, 7  ;;  %v414_v44 = vadd.f32 -0.1, %v1686_v17 }
  0x5d   : > { %684 = vperm.xlu0 %1366, %v1403_v58   ;;  %679 = vperm.xlu1 %1367, %v1405_v59  }
  0x61   : > { %1369 = vset.pattern.permute.xlu0 %v1550_v62  ;;  %1368 = vset.pattern.permute.xlu1 %v1550_v62 }
  0x62   : > { %790 = vperm.xlu0 %1369, %v229_v60   ;;  %785 = vperm.xlu1 %1368, %v228_v61   ;;  %v406_v60 = vadd.f32 -0.1, %v1638_v13  ;;  %v423_v61 = vsub.s32 0, %v422_v57 }
  0x66   : > { %805 = vperm.xlu0 %1369, %v232_v63   ;;  %795 = vperm.xlu1 %1368, %v230_v0   ;;  %v427_v0 = vsub.s32 1, %v422_v57 }
  0x6a   : > { %815 = vperm.xlu0 %1369, %v234_v1   ;;  %800 = vperm.xlu1 %1368, %v231_v3   ;;  %v1763_v1 = vrot.slane %v227_v14, %v423_v61 }
  0x6e   : > { %825 = vperm.xlu0 %1369, %v236_v4   ;;  %810 = vperm.xlu1 %1368, %v233_v5   ;;  %v416_v4 = vadd.f32 -0.1, %v1694_v32  ;;  %v1770_v5 = vrot.slane %v227_v14, %v427_v0  ;;  %v418_v32 = vadd.f32 -0.1, %v1704_v55 }
  0x72   : > { %835 = vperm.xlu0 %1369, %v238_v6   ;;  %820 = vperm.xlu1 %1368, %v235_v7   ;;  %v409_v6 = vadd.f32 -0.1, %v1648_v19  ;;  %v411_v19 = vadd.f32 -0.1, %v1664_v43 }
  0x76   : > { %845 = vperm.xlu0 %1369, %v240_v8   ;;  %830 = vperm.xlu1 %1368, %v237_v9  }
  0x7a   : > { %855 = vperm.xlu0 %1369, %v242_v10   ;;  %840 = vperm.xlu1 %1368, %v239_v11  }
  0x7e   : > { %1370 = vset.pattern.permute.xlu0 %v1551_v20  ;;  %850 = vperm.xlu1 %1368, %v241_v18  }
  0x7f   : > { %897 = vperm.xlu0 %1370, %v388_v12  }
  0x82   : > { %860 = vperm.xlu1 %1368, %v243_v22  }
  0x83   : > { %912 = vperm.xlu0 %1370, %v391_v21  }
  0x86   : > { %1371 = vset.pattern.permute.xlu1 %v1551_v20 }
  0x87   : > { %922 = vperm.xlu0 %1370, %v393_v24   ;;  %902 = vperm.xlu1 %1371, %v389_v25  }
  0x8b   : > { %932 = vperm.xlu0 %1370, %v395_v26   ;;  %907 = vperm.xlu1 %1371, %v390_v27  }
  0x8f   : > { %942 = vperm.xlu0 %1370, %v397_v28   ;;  %917 = vperm.xlu1 %1371, %v392_v30  }
  0x93   : > { %952 = vperm.xlu0 %1370, %v399_v31   ;;  %927 = vperm.xlu1 %1371, %v394_v33  }
  0x97   : > { %962 = vperm.xlu0 %1370, %v401_v34   ;;  %937 = vperm.xlu1 %1371, %v396_v35   ;;  %v413_v34 = vadd.f32 -0.1, %v1671_v53  ;;  %v415_v35 = vadd.f32 -0.1, %v1680_v2 }
  0x9b   : > { %v444_v38 = vpop.permute.xlu1 %443  ;;  %972 = vperm.xlu0 %1370, %v403_v36   ;;  %v434_v39 = vpop.permute.xlu0 %433  ;;  %947 = vperm.xlu1 %1371, %v398_v37   ;;  %v417_v36 = vadd.f32 -0.1, %v1691_v29 }
  0x9c   : > { %v515_v17 = vsub.f32 %v1763_v1, %v444_v38  ;;  %v511_v15 = vsub.f32 %v1763_v1, %v434_v39  ;;  %v512_v9 = vsub.f32 %v1770_v5, %v434_v39  ;;  %v516_v18 = vsub.f32 %v1770_v5, %v444_v38 }
  0x9e   : > { %v547_v20 = vmul.f32 %v515_v17, %v515_v17  ;;  %v543_v24 = vmul.f32 %v511_v15, %v511_v15  ;;  %v544_v25 = vmul.f32 %v512_v9, %v512_v9  ;;  %v548_v37 = vmul.f32 %v516_v18, %v516_v18 }
  0x9f   : > { %v449_v45 = vpop.permute.xlu1 %448  ;;  %1373 = vset.pattern.permute.xlu0 %v1552_v46  ;;  %v439_v47 = vpop.permute.xlu0 %438  ;;  %957 = vperm.xlu1 %1371, %v400_v42  }
  0xa0   : > { %1046 = vperm.xlu0 %1373, %v405_v41   ;;  %v517_v10 = vsub.f32 %v1763_v1, %v449_v45  ;;  %v513_v11 = vsub.f32 %v1763_v1, %v439_v47  ;;  %v514_v12 = vsub.f32 %v1770_v5, %v439_v47  ;;  %v518_v21 = vsub.f32 %v1770_v5, %v449_v45 }
  0xa1   : > { %v579_v38 = vsub.f32 0.0, %v547_v20  ;;  %v1799_v41 = vadd.f32 -0.1, %v1700_v40  ;;  %v575_v42 = vsub.f32 0.0, %v543_v24  ;;  %v576_v45 = vsub.f32 0.0, %v544_v25 }
  0xa2   : > { %v549_v26 = vmul.f32 %v517_v10, %v517_v10  ;;  %v545_v28 = vmul.f32 %v513_v11, %v513_v11  ;;  %v546_v30 = vmul.f32 %v514_v12, %v514_v12  ;;  %v550_v39 = vmul.f32 %v518_v21, %v518_v21 }
  0xa3   : > { %v459_v51 = vpop.permute.xlu1 %458  ;;  %v454_v52 = vpop.permute.xlu0 %453  ;;  %967 = vperm.xlu1 %1371, %v402_v49   ;;  %v580_v61 = vsub.f32 0.0, %v548_v37 }
  0xa4   : > { %1061 = vperm.xlu0 %1373, %v408_v48   ;;  %v521_v27 = vsub.f32 %v1763_v1, %v459_v51  ;;  %v522_v31 = vsub.f32 %v1770_v5, %v459_v51  ;;  %v519_v43 = vsub.f32 %v1763_v1, %v454_v52  ;;  %v520_v33 = vsub.f32 %v1770_v5, %v454_v52 }
  0xa5   : > { %v577_v49 = vsub.f32 0.0, %v545_v28  ;;  %v578_v50 = vsub.f32 0.0, %v546_v30  ;;  %v582_v40 = vsub.f32 0.0, %v550_v39 }
  0xa6   : > { %v553_v47 = vmul.f32 %v521_v27, %v521_v27  ;;  %v554_v51 = vmul.f32 %v522_v31, %v522_v31  ;;  %v551_v52 = vmul.f32 %v519_v43, %v519_v43  ;;  %v552_v53 = vmul.f32 %v520_v33, %v520_v33 }
  0xa7   : > { %v1748_v58 = vpop.permute.xlu1 %468  ;;  %v1750_v59 = vpop.permute.xlu0 %463  ;;  %1372 = vset.pattern.permute.xlu1 %v1552_v46  ;;  %v581_v46 = vsub.f32 0.0, %v549_v26 }
  0xa8   : > { %1071 = vperm.xlu0 %1373, %v410_v56   ;;  %1041 = vperm.xlu1 %1372, %v404_v16   ;;  %v525_v2 = vsub.f32 %v1763_v1, %v1748_v58  ;;  %v526_v57 = vsub.f32 %v1770_v5, %v1748_v58  ;;  %v585_v14 = vsub.f32 0.0, %v553_v47  ;;  %v524_v0 = vsub.f32 %v1770_v5, %v1750_v59 }
  0xa9   : > { %v583_v15 = vsub.f32 0.0, %v551_v52  ;;  %v584_v9 = vsub.f32 0.0, %v552_v53 }
  0xaa   : > { %v557_v10 = vmul.f32 %v525_v2, %v525_v2  ;;  %v558_v12 = vmul.f32 %v526_v57, %v526_v57  ;;  %v556_v21 = vmul.f32 %v524_v0, %v524_v0 }
  0xab   : > { %v1754_v62 = vpop.permute.xlu1 %478  ;;  %v1756_v63 = vpop.permute.xlu0 %473 }
  0xac   : > { %1081 = vperm.xlu0 %1373, %v412_v23   ;;  %1051 = vperm.xlu1 %1372, %v406_v60   ;;  %v528_v24 = vsub.f32 %v1770_v5, %v1756_v63  ;;  %v589_v31 = vsub.f32 0.0, %v557_v10 }
  0xaf   : > { %v1765_v3 = vpop.permute.xlu1 %488  ;;  %v1767_v13 = vpop.permute.xlu0 %483 }
  0xb0   : > { %1091 = vperm.xlu0 %1373, %v414_v44   ;;  %1056 = vperm.xlu1 %1372, %v407_v54   ;;  %v523_v44 = vsub.f32 %v1763_v1, %v1750_v59  ;;  %v527_v59 = vsub.f32 %v1763_v1, %v1756_v63  ;;  %v533_v25 = vsub.f32 %v1763_v1, %v1765_v3 }
  0xb1   : > { %v534_v27 = vsub.f32 %v1770_v5, %v1765_v3  ;;  %v531_v28 = vsub.f32 %v1763_v1, %v1767_v13  ;;  %v532_v33 = vsub.f32 %v1770_v5, %v1767_v13 }
  0xb2   : > { %v555_v20 = vmul.f32 %v523_v44, %v523_v44  ;;  %v559_v37 = vmul.f32 %v527_v59, %v527_v59 }
  0xb3   : > { %v1774_v7 = vpop.permute.xlu1 %498  ;;  %v1776_v8 = vpop.permute.xlu0 %493  ;;  %v564_v52 = vmul.f32 %v532_v33, %v532_v33 }
  0xb4   : > { %1101 = vperm.xlu0 %1373, %v416_v4   ;;  %1066 = vperm.xlu1 %1372, %v409_v6   ;;  %v586_v4 = vsub.f32 0.0, %v554_v51  ;;  %v529_v6 = vsub.f32 %v1763_v1, %v1754_v62  ;;  %v587_v3 = vsub.f32 0.0, %v555_v20  ;;  %v535_v0 = vsub.f32 %v1763_v1, %v1776_v8 }
  0xb7   : > { %v1787_v22 = vpop.permute.xlu0 %503  ;;  %v1790_v55 = vpop.permute.xlu1 %508 }
  0xb8   : > { %1111 = vperm.xlu0 %1373, %v418_v32   ;;  %1076 = vperm.xlu1 %1372, %v411_v19   ;;  %v530_v32 = vsub.f32 %v1770_v5, %v1754_v62  ;;  %v561_v62 = vmul.f32 %v529_v6, %v529_v6  ;;  %v541_v20 = vsub.f32 %v1763_v1, %v1790_v55 }
  0xba   : > { %v562_v43 = vmul.f32 %v530_v32, %v530_v32 }
  0xbc   : > { %v610_v48 = vpop.permute.xlu0 %609  ;;  %v615_v29 = vpop.permute.xlu1 %614  ;;  %1086 = vperm.xlu1 %1372, %v413_v34   ;;  %v594_v13 = vsub.f32 0.0, %v562_v43 }
  0xbd   : > { %v1803_v56 = vmul.f32 %v610_v48, %v575_v42  ;;  %v1805_v16 = vmul.f32 %v610_v48, %v576_v45  ;;  %v1809_v23 = vmul.f32 %v615_v29, %v577_v49  ;;  %v1811_v60 = vmul.f32 %v615_v29, %v578_v50 }
  0xbe   : > { %v588_v42 = vsub.f32 0.0, %v556_v21  ;;  %v560_v45 = vmul.f32 %v528_v24, %v528_v24  ;;  %v593_v48 = vsub.f32 0.0, %v561_v62  ;;  %v566_v49 = vmul.f32 %v534_v27, %v534_v27 }
  0xbf   : > { %v563_v50 = vmul.f32 %v531_v28, %v531_v28  ;;  %v591_v29 = vsub.f32 0.0, %v559_v37  ;;  %v721_v32 = vmul.f32 1.442695, %v1805_v16  ;;  %v567_v24 = vmul.f32 %v535_v0, %v535_v0 }
  0xc0   : > { %v625_v54 = vpop.permute.xlu0 %624  ;;  %v620_v11 = vpop.permute.xlu1 %619  ;;  %1096 = vperm.xlu1 %1372, %v415_v35   ;;  %v590_v35 = vsub.f32 0.0, %v558_v12  ;;  %v598_v6 = vsub.f32 0.0, %v566_v49  ;;  %v540_v62 = vsub.f32 %v1770_v5, %v1787_v22  ;;  %v573_v37 = vmul.f32 %v541_v20, %v541_v20 }
  0xc1   : > { %v1819_v17 = vmul.f32 %v625_v54, %v581_v46  ;;  %v1821_v58 = vmul.f32 %v625_v54, %v582_v40  ;;  %v1827_v19 = vmul.f32 %v620_v11, %v579_v38  ;;  %v1829_v18 = vmul.f32 %v620_v11, %v580_v61 }
  0xc2   : > { %v565_v46 = vmul.f32 %v533_v25, %v533_v25  ;;  %v538_v40 = vsub.f32 %v1770_v5, %v1774_v7  ;;  %v536_v54 = vsub.f32 %v1770_v5, %v1776_v8 }
  0xc3   : > { %v727_v27 = vmul.f32 1.442695, %v1827_v19  ;;  %v729_v43 = vmul.f32 1.442695, %v1829_v18  ;;  %v731_v19 = vmul.f32 1.442695, %v1819_v17 }
  0xc4   : > { %v635_v26 = vpop.permute.xlu0 %634  ;;  %v630_v34 = vpop.permute.xlu1 %629  ;;  %1106 = vperm.xlu1 %1372, %v417_v36   ;;  %v537_v36 = vsub.f32 %v1763_v1, %v1774_v7  ;;  %v597_v44 = vsub.f32 0.0, %v565_v46  ;;  %v596_v7 = vsub.f32 0.0, %v564_v52  ;;  %v570_v59 = vmul.f32 %v538_v40, %v538_v40 }
  0xc5   : > { %v1839_v30 = vmul.f32 %v635_v26, %v585_v14  ;;  %v1843_v63 = vmul.f32 %v635_v26, %v586_v4  ;;  %v1845_v38 = vmul.f32 %v630_v34, %v583_v15  ;;  %v1847_v39 = vmul.f32 %v630_v34, %v584_v9 }
  0xc6   : > { %v592_v14 = vsub.f32 0.0, %v560_v45  ;;  %v595_v15 = vsub.f32 0.0, %v563_v50  ;;  %v569_v10 = vmul.f32 %v537_v36, %v537_v36  ;;  %v568_v25 = vmul.f32 %v536_v54, %v536_v54 }
  0xc7   : > { %v539_v26 = vsub.f32 %v1763_v1, %v1787_v22  ;;  %v733_v18 = vmul.f32 1.442695, %v1821_v58  ;;  %v605_v52 = vsub.f32 0.0, %v573_v37  ;;  %v739_v0 = vmul.f32 1.442695, %v1839_v30 }
  0xc8   : > { %v645_v47 = vpop.permute.xlu0 %644  ;;  %v640_v53 = vpop.permute.xlu1 %639  ;;  %1116 = vperm.xlu1 %1372, %v1799_v41   ;;  %v719_v41 = vmul.f32 1.442695, %v1803_v56  ;;  %v542_v56 = vsub.f32 %v1770_v5, %v1790_v55  ;;  %v600_v45 = vsub.f32 0.0, %v568_v25  ;;  %v741_v17 = vmul.f32 1.442695, %v1843_v63 }
  0xc9   : > { %v1849_v51 = vmul.f32 %v645_v47, %v589_v31  ;;  %v1853_v2 = vmul.f32 %v645_v47, %v590_v35  ;;  %v1858_v57 = vmul.f32 %v640_v53, %v587_v3  ;;  %v1860_v61 = vmul.f32 %v640_v53, %v588_v42 }
  0xca   : > { %1406 = vpow2.f32 %v719_v41  ;;  %v601_v31 = vsub.f32 0.0, %v569_v10  ;;  %v602_v35 = vsub.f32 0.0, %v570_v59  ;;  %v599_v42 = vsub.f32 0.0, %v567_v24 }
  0xcb   : > { %1408 = vpow2.f32 %v721_v32  ;;  %v574_v46 = vmul.f32 %v542_v56, %v542_v56  ;;  %v571_v22 = vmul.f32 %v539_v26, %v539_v26  ;;  %v747_v41 = vmul.f32 1.442695, %v1849_v51 }
  0xcc   : > { %v655_v4 = vpop.permute.xlu0 %654  ;;  %v650_v11 = vpop.permute.xlu1 %649  ;;  %1410 = vpow2.f32 %v727_v27  ;;  %v749_v32 = vmul.f32 1.442695, %v1853_v2 }
  0xcd   : > { %v1867_v9 = vmul.f32 %v655_v4, %v593_v48  ;;  %v1870_v12 = vmul.f32 %v655_v4, %v594_v13  ;;  %v1874_v21 = vmul.f32 %v650_v11, %v591_v29  ;;  %v1876_v8 = vmul.f32 %v650_v11, %v592_v14 }
  0xce   : > { %v572_v48 = vmul.f32 %v540_v62, %v540_v62  ;;  %1412 = vpow2.f32 %v729_v43  ;;  %v606_v29 = vsub.f32 0.0, %v574_v46  ;;  %v603_v40 = vsub.f32 0.0, %v571_v22 }
  0xcf   : > { %1414 = vpow2.f32 %v731_v19  ;;  %v755_v20 = vmul.f32 1.442695, %v1867_v9  ;;  %v757_v51 = vmul.f32 1.442695, %v1870_v12 }
  0xd0   : > { %v665_v16 = vpop.permute.xlu0 %664  ;;  %v660_v33 = vpop.permute.xlu1 %659  ;;  %1416 = vpow2.f32 %v733_v18 }
  0xd1   : > { %v709_v28 = vmul.f32 %v665_v16, %v597_v44  ;;  %v710_v34 = vmul.f32 %v665_v16, %v598_v6  ;;  %v1886_v55 = vmul.f32 %v660_v33, %v595_v15  ;;  %v1888_v3 = vmul.f32 %v660_v33, %v596_v7 }
  0xd2   : > { %v604_v44 = vsub.f32 0.0, %v572_v48  ;;  %1418 = vpow2.f32 %v739_v0 }
  0xd3   : > { %1420 = vpow2.f32 %v741_v17  ;;  %v763_v62 = vmul.f32 1.442695, %v709_v28  ;;  %v765_v43 = vmul.f32 1.442695, %v710_v34 }
  0xd4   : > { %v675_v47 = vpop.permute.xlu0 %674  ;;  %v670_v50 = vpop.permute.xlu1 %669  ;;  %1422 = vpow2.f32 %v747_v41 }
  0xd5   : > { %v713_v49 = vmul.f32 %v675_v47, %v601_v31  ;;  %v714_v13 = vmul.f32 %v675_v47, %v602_v35  ;;  %v1892_v36 = vmul.f32 %v670_v50, %v599_v42  ;;  %v1894_v53 = vmul.f32 %v670_v50, %v600_v45 }
  0xd6   : > { %1424 = vpow2.f32 %v749_v32 }
  0xd7   : > { %v1407_v10 = vpop.eup %1406  ;;  %1426 = vpow2.f32 %v755_v20  ;;  %v771_v12 = vmul.f32 1.442695, %v713_v49  ;;  %v773_v46 = vmul.f32 1.442695, %v714_v13 }
  0xd8   : > { %v685_v14 = vpop.permute.xlu0 %684  ;;  %v680_v4 = vpop.permute.xlu1 %679  ;;  %1428 = vpow2.f32 %v757_v51 }
  0xd9   : > { %v717_v54 = vmul.f32 %v685_v14, %v605_v52  ;;  %v718_v58 = vmul.f32 %v685_v14, %v606_v29  ;;  %v1898_v6 = vmul.f32 %v680_v4, %v603_v40  ;;  %v1900_v15 = vmul.f32 %v680_v4, %v604_v44  ;;  %v1409_v30 = vpop.eup %1408 }
  0xda   : > { %v1411_v25 = vpop.eup %1410  ;;  %1430 = vpow2.f32 %v763_v62 }
  0xdb   : > { %v1413_v56 = vpop.eup %1412  ;;  %1432 = vpow2.f32 %v765_v43  ;;  %v779_v34 = vmul.f32 1.442695, %v717_v54  ;;  %v781_v50 = vmul.f32 1.442695, %v718_v58 }
  0xdc   : > { %v1415_v31 = vpop.eup %1414  ;;  %1434 = vpow2.f32 %v771_v12 }
  0xdd   : > { %v1903_v7 = vpop.permute.xlu0 %790  ;;  %v786_v11 = vpop.permute.xlu1 %785  ;;  %1436 = vpow2.f32 %v773_v46 }
  0xde   : > { %v1906_v59 = vmul.f32 %v1407_v10, %v786_v11  ;;  %v1908_v63 = vmul.f32 %v1409_v30, %v786_v11  ;;  %v1417_v9 = vpop.eup %1416  ;;  %1438 = vpow2.f32 %v779_v34 }
  0xdf   : > { %v1419_v45 = vpop.eup %1418  ;;  %1440 = vpow2.f32 %v781_v50  ;;  %v735_v50 = vmul.f32 1.442695, %v1845_v38  ;;  %v753_v38 = vmul.f32 1.442695, %v1876_v8 }
  0xe0   : > { %v1421_v22 = vpop.eup %1420 }
  0xe1   : > { %v1911_v24 = vpop.permute.xlu0 %805  ;;  %v796_v26 = vpop.permute.xlu1 %795 }
  0xe2   : > { %v1914_v16 = vmul.f32 %v1411_v25, %v796_v26  ;;  %v1916_v2 = vmul.f32 %v1413_v56, %v796_v26  ;;  %v1423_v18 = vpop.eup %1422 }
  0xe3   : > { %v1425_v52 = vpop.eup %1424 }
  0xe4   : > { %v1427_v14 = vpop.eup %1426 }
  0xe5   : > { %v1918_v27 = vpop.permute.xlu0 %815  ;;  %v801_v33 = vpop.permute.xlu1 %800 }
  0xe6   : > { %v1920_v35 = vmul.f32 %v1415_v31, %v801_v33  ;;  %v1922_v37 = vmul.f32 %v1417_v9, %v801_v33  ;;  %v1429_v44 = vpop.eup %1428 }
  0xe7   : > { %v1431_v58 = vpop.eup %1430 }
  0xe8   : > { %v1433_v41 = vpop.eup %1432 }
  0xe9   : > { %v1924_v42 = vpop.permute.xlu0 %825  ;;  %v811_v28 = vpop.permute.xlu1 %810 }
  0xea   : > { %v1926_v47 = vmul.f32 %v1419_v45, %v811_v28  ;;  %v1928_v48 = vmul.f32 %v1421_v22, %v811_v28  ;;  %v1435_v11 = vpop.eup %1434  ;;  %v723_v22 = vmul.f32 1.442695, %v1809_v23  ;;  %v725_v28 = vmul.f32 1.442695, %v1811_v60 }
  0xeb   : > { %v1437_v25 = vpop.eup %1436  ;;  %v745_v23 = vmul.f32 1.442695, %v1860_v61 }
  0xec   : > { %v1439_v62 = vpop.eup %1438  ;;  %1442 = vpow2.f32 %v723_v22 }
  0xed   : > { %v1930_v19 = vpop.permute.xlu0 %835  ;;  %v821_v49 = vpop.permute.xlu1 %820  ;;  %1444 = vpow2.f32 %v725_v28 }
  0xee   : > { %v1932_v29 = vmul.f32 %v1423_v18, %v821_v49  ;;  %v1934_v40 = vmul.f32 %v1425_v52, %v821_v49  ;;  %v1441_v43 = vpop.eup %1440  ;;  %v737_v52 = vmul.f32 1.442695, %v1847_v39  ;;  %1446 = vpow2.f32 %v735_v50 }
  0xf0   : > { %1448 = vpow2.f32 %v737_v52 }
  0xf1   : > { %v1936_v13 = vpop.permute.xlu0 %845  ;;  %v831_v0 = vpop.permute.xlu1 %830 }
  0xf2   : > { %v1938_v17 = vmul.f32 %v1427_v14, %v831_v0  ;;  %v1940_v54 = vmul.f32 %v1429_v44, %v831_v0  ;;  %v743_v44 = vmul.f32 1.442695, %v1858_v57  ;;  %v751_v0 = vmul.f32 1.442695, %v1874_v21 }
  0xf3   : > { %v761_v57 = vmul.f32 1.442695, %v1888_v3  ;;  %v769_v3 = vmul.f32 1.442695, %v1894_v53 }
  0xf4   : > { %1450 = vpow2.f32 %v743_v44 }
  0xf5   : > { %v1942_v4 = vpop.permute.xlu0 %855  ;;  %v841_v10 = vpop.permute.xlu1 %840  ;;  %1452 = vpow2.f32 %v745_v23 }
  0xf6   : > { %v1944_v32 = vmul.f32 %v1431_v58, %v841_v10  ;;  %v1946_v30 = vmul.f32 %v1433_v41, %v841_v10  ;;  %1454 = vpow2.f32 %v751_v0  ;;  %v759_v41 = vmul.f32 1.442695, %v1886_v55 }
  0xf7   : > { %1456 = vpow2.f32 %v753_v38 }
  0xf8   : > { %1458 = vpow2.f32 %v759_v41  ;;  %v777_v41 = vmul.f32 1.442695, %v1900_v15 }
  0xf9   : > { %v851_v51 = vpop.permute.xlu1 %850  ;;  %v1443_v61 = vpop.eup %1442  ;;  %1460 = vpow2.f32 %v761_v57 }
  0xfa   : > { %v1948_v20 = vpop.permute.xlu0 %897  ;;  %v1950_v56 = vmul.f32 %v1435_v11, %v851_v51  ;;  %v1952_v26 = vmul.f32 %v1437_v25, %v851_v51  ;;  %v1445_v8 = vpop.eup %1444  ;;  %v767_v51 = vmul.f32 1.442695, %v1892_v36  ;;  %v775_v36 = vmul.f32 1.442695, %v1898_v6 }
  0xfb   : > { %v866_v55 = vmul.f32 %v1445_v8, %v1903_v7  ;;  %v975_v15 = vmul.f32 %v1948_v20, %v1763_v1 }
  0xfc   : > { %1462 = vpow2.f32 %v767_v51 }
  0xfd   : > { %v861_v9 = vpop.permute.xlu1 %860  ;;  %1464 = vpow2.f32 %v769_v3 }
  0xfe   : > { %v1954_v31 = vpop.permute.xlu0 %912  ;;  %v1956_v33 = vmul.f32 %v1439_v62, %v861_v9  ;;  %v1958_v12 = vmul.f32 %v1441_v43, %v861_v9  ;;  %v865_v62 = vmul.f32 %v1443_v61, %v1903_v7  ;;  %v1447_v9 = vpop.eup %1446  ;;  %1466 = vpow2.f32 %v775_v36 }
  0xff   : > { %v1449_v52 = vpop.eup %1448  ;;  %v871_v7 = vmul.f32 %v1447_v9, %v1911_v24  ;;  %1468 = vpow2.f32 %v777_v41 }
 0x100   : > { %v872_v23 = vmul.f32 %v1449_v52, %v1911_v24 }
 0x101   : > { %v1451_v57 = vpop.eup %1450 }
 0x102   : > { %v1960_v45 = vpop.permute.xlu0 %922  ;;  %v903_v46 = vpop.permute.xlu1 %902 }
 0x103   : > { %v977_v11 = vmul.f32 %v903_v46, %v1763_v1  ;;  %v978_v21 = vmul.f32 %v903_v46, %v1770_v5 }
 0x105   : > { %v1009_v28 = vadd.f32 %v977_v11, %v865_v62  ;;  %v1010_v50 = vadd.f32 %v978_v21, %v866_v55  ;;  %v1453_v11 = vpop.eup %1452  ;;  %v976_v21 = vmul.f32 %v1948_v20, %v1770_v5 }
 0x106   : > { %v1964_v34 = vpop.permute.xlu0 %932  ;;  %v1966_v18 = vpop.permute.xlu1 %907  ;;  %v876_v51 = vmul.f32 %v1453_v11, %v1918_v27 }
 0x107   : > { %v1455_v9 = vpop.eup %1454 }
 0x108   : > { %v879_v52 = vmul.f32 %v1455_v9, %v1924_v42 }
 0x10a   : > { %v1970_v49 = vpop.permute.xlu0 %942  ;;  %v918_v14 = vpop.permute.xlu1 %917 }
 0x10b   : > { %v983_v22 = vmul.f32 %v918_v14, %v1763_v1  ;;  %v984_v46 = vmul.f32 %v918_v14, %v1770_v5 }
 0x10d   : > { %v1015_v6 = vadd.f32 %v983_v22, %v871_v7  ;;  %v1016_v24 = vadd.f32 %v984_v46, %v872_v23  ;;  %v1008_v7 = vadd.f32 %v976_v21, %v1908_v63  ;;  %v979_v23 = vmul.f32 %v1966_v18, %v1763_v1 }
 0x10e   : > { %v1974_v60 = vpop.permute.xlu0 %952  ;;  %v928_v58 = vpop.permute.xlu1 %927  ;;  %v982_v21 = vmul.f32 %v1954_v31, %v1770_v5 }
 0x10f   : > { %v987_v14 = vmul.f32 %v928_v58, %v1763_v1  ;;  %v988_v61 = vmul.f32 %v928_v58, %v1770_v5  ;;  %v875_v58 = vmul.f32 %v1451_v57, %v1918_v27 }
 0x111   : > { %v1020_v20 = vadd.f32 %v988_v61, %v876_v51 }
 0x112   : > { %v1978_v39 = vpop.permute.xlu0 %962  ;;  %v938_v10 = vpop.permute.xlu1 %937 }
 0x113   : > { %v991_v22 = vmul.f32 %v938_v10, %v1763_v1  ;;  %v992_v46 = vmul.f32 %v938_v10, %v1770_v5  ;;  %v980_v10 = vmul.f32 %v1966_v18, %v1770_v5 }
 0x116   : > { %v1985_v25 = vpop.permute.xlu0 %972  ;;  %v948_v43 = vpop.permute.xlu1 %947 }
 0x11a   : > { %v1998_v0 = vpop.permute.xlu1 %957 }
 0x11b   : > { %v1047_v44 = vpop.permute.xlu0 %1046  ;;  %v1000_v9 = vmul.f32 %v1998_v0, %v1770_v5 }
 0x11c   : > { %v1121_v38 = vadd.f32 %v1047_v44, %v1009_v28  ;;  %v1122_v53 = vadd.f32 %v1047_v44, %v1010_v50  ;;  %v1457_v28 = vpop.eup %1456  ;;  %v1019_v50 = vadd.f32 %v987_v14, %v875_v58  ;;  %v1007_v44 = vadd.f32 %v975_v15, %v1906_v59 }
 0x11d   : > { %v880_v27 = vmul.f32 %v1457_v28, %v1924_v42  ;;  %v1459_v41 = vpop.eup %1458  ;;  %v1023_v14 = vadd.f32 %v991_v22, %v879_v52  ;;  %v996_v59 = vmul.f32 %v948_v43, %v1770_v5  ;;  %v981_v15 = vmul.f32 %v1954_v31, %v1763_v1 }
 0x11e   : > { %1153 = vst [vmem:[%s2003_s4 + $0x10] sm:$0xff] %v1121_v38  ;;  %1154 = vst [vmem:[%s2003_s4 + $0x18] sm:$0xff] %v1122_v53  ;;  %v2013_v62 = vpop.permute.xlu1 %967  ;;  %v1461_v61 = vpop.eup %1460  ;;  %v883_v11 = vmul.f32 %v1459_v41, %v1930_v19 }
 0x11f   : > { %v1062_v8 = vpop.permute.xlu0 %1061  ;;  %v1024_v42 = vadd.f32 %v992_v46, %v880_v27  ;;  %v884_v18 = vmul.f32 %v1461_v61, %v1930_v19  ;;  %v1463_v58 = vpop.eup %1462  ;;  %v999_v19 = vmul.f32 %v1998_v0, %v1763_v1  ;;  %v1013_v27 = vadd.f32 %v981_v15, %v1920_v35 }
 0x120   : > { %v1127_v55 = vadd.f32 %v1062_v8, %v1015_v6  ;;  %v1128_v3 = vadd.f32 %v1062_v8, %v1016_v24  ;;  %v995_v6 = vmul.f32 %v948_v43, %v1763_v1  ;;  %v1465_v46 = vpop.eup %1464  ;;  %v1014_v0 = vadd.f32 %v982_v21, %v1922_v37 }
 0x121   : > { %v1003_v37 = vmul.f32 %v2013_v62, %v1763_v1  ;;  %v1004_v41 = vmul.f32 %v2013_v62, %v1770_v5  ;;  %v989_v61 = vmul.f32 %v1964_v34, %v1763_v1 }
 0x122   : > { %1159 = vst [vmem:[%s2003_s4 + $0x40] sm:$0xff] %v1127_v55  ;;  %1160 = vst [vmem:[%s2003_s4 + $0x48] sm:$0xff] %v1128_v3  ;;  %v1011_v55 = vadd.f32 %v979_v23, %v1914_v16  ;;  %v1012_v3 = vadd.f32 %v980_v10, %v1916_v2  ;;  %v887_v16 = vmul.f32 %v1463_v58, %v1936_v13 }
 0x123   : > { %v1072_v36 = vpop.permute.xlu0 %1071  ;;  %v1042_v57 = vpop.permute.xlu1 %1041  ;;  %v888_v2 = vmul.f32 %v1465_v46, %v1936_v13  ;;  %v1021_v58 = vadd.f32 %v989_v61, %v1932_v29 }
 0x124   : > { %v1131_v38 = vadd.f32 %v1072_v36, %v1019_v50  ;;  %v1132_v53 = vadd.f32 %v1072_v36, %v1020_v20  ;;  %v1119_v63 = vadd.f32 %v1042_v57, %v1007_v44  ;;  %v1120_v24 = vadd.f32 %v1042_v57, %v1008_v7  ;;  %v1467_v36 = vpop.eup %1466 }
 0x125   : > { %v1027_v50 = vadd.f32 %v995_v6, %v883_v11  ;;  %v1028_v20 = vadd.f32 %v996_v59, %v884_v18  ;;  %v985_v44 = vmul.f32 %v1960_v45, %v1763_v1  ;;  %v986_v7 = vmul.f32 %v1960_v45, %v1770_v5  ;;  %v1469_v35 = vpop.eup %1468 }
 0x126   : > { %1163 = vst [vmem:[%s2003_s4 + $0x60] sm:$0xff] %v1131_v38  ;;  %1164 = vst [vmem:[%s2003_s4 + $0x68] sm:$0xff] %v1132_v53  ;;  %v1031_v38 = vadd.f32 %v999_v19, %v887_v16  ;;  %v1032_v53 = vadd.f32 %v1000_v9, %v888_v2  ;;  %v990_v6 = vmul.f32 %v1964_v34, %v1770_v5 }
 0x127   : > { %v1082_v8 = vpop.permute.xlu0 %1081  ;;  %1151 = vst [vmem:[%s2003_s4] sm:$0xff] %v1119_v63  ;;  %1152 = vst [vmem:[%s2003_s4 + $0x8] sm:$0xff] %v1120_v24  ;;  %v1052_v22 = vpop.permute.xlu1 %1051  ;;  %v1017_v24 = vadd.f32 %v985_v44, %v1926_v47  ;;  %v1018_v11 = vadd.f32 %v986_v7, %v1928_v48  ;;  %v993_v47 = vmul.f32 %v1970_v49, %v1763_v1 }
 0x128   : > { %v1135_v43 = vadd.f32 %v1082_v8, %v1023_v14  ;;  %v1136_v51 = vadd.f32 %v1082_v8, %v1024_v42  ;;  %v1123_v31 = vadd.f32 %v1052_v22, %v1011_v55  ;;  %v1124_v28 = vadd.f32 %v1052_v22, %v1012_v3 }
 0x129   : > { %v891_v14 = vmul.f32 %v1467_v36, %v1942_v4  ;;  %v892_v42 = vmul.f32 %v1469_v35, %v1942_v4  ;;  %v994_v48 = vmul.f32 %v1970_v49, %v1770_v5  ;;  %v998_v9 = vmul.f32 %v1974_v60, %v1770_v5 }
 0x12a   : > { %1167 = vst [vmem:[%s2003_s4 + $0x80] sm:$0xff] %v1135_v43  ;;  %1168 = vst [vmem:[%s2003_s4 + $0x88] sm:$0xff] %v1136_v51  ;;  %v1022_v43 = vadd.f32 %v990_v6, %v1934_v40  ;;  %v997_v40 = vmul.f32 %v1974_v60, %v1763_v1  ;;  %v1025_v49 = vadd.f32 %v993_v47, %v1938_v17 }
 0x12b   : > { %v1092_v52 = vpop.permute.xlu0 %1091  ;;  %1155 = vst [vmem:[%s2003_s4 + $0x20] sm:$0xff] %v1123_v31  ;;  %1156 = vst [vmem:[%s2003_s4 + $0x28] sm:$0xff] %v1124_v28  ;;  %v1057_v13 = vpop.permute.xlu1 %1056  ;;  %v1035_v21 = vadd.f32 %v1003_v37, %v891_v14  ;;  %v1036_v34 = vadd.f32 %v1004_v41, %v892_v42  ;;  %v1026_v22 = vadd.f32 %v994_v48, %v1940_v54 }
 0x12c   : > { %v1139_v23 = vadd.f32 %v1092_v52, %v1027_v50  ;;  %v1140_v10 = vadd.f32 %v1092_v52, %v1028_v20  ;;  %v1125_v45 = vadd.f32 %v1057_v13, %v1013_v27  ;;  %v1126_v57 = vadd.f32 %v1057_v13, %v1014_v0 }
 0x12d   : > { %v1001_v50 = vmul.f32 %v1978_v39, %v1763_v1  ;;  %v1002_v20 = vmul.f32 %v1978_v39, %v1770_v5  ;;  %v1029_v60 = vadd.f32 %v997_v40, %v1944_v32  ;;  %v1030_v17 = vadd.f32 %v998_v9, %v1946_v30 }
 0x12e   : > { %1171 = vst [vmem:[%s2003_s4 + $0xa0] sm:$0xff] %v1139_v23  ;;  %1172 = vst [vmem:[%s2003_s4 + $0xa8] sm:$0xff] %v1140_v10  ;;  %v1005_v52 = vmul.f32 %v1985_v25, %v1763_v1  ;;  %v1006_v27 = vmul.f32 %v1985_v25, %v1770_v5 }
 0x12f   : > { %v1102_v59 = vpop.permute.xlu0 %1101  ;;  %1157 = vst [vmem:[%s2003_s4 + $0x30] sm:$0xff] %v1125_v45  ;;  %1158 = vst [vmem:[%s2003_s4 + $0x38] sm:$0xff] %v1126_v57  ;;  %v1067_v18 = vpop.permute.xlu1 %1066  ;;  %v1033_v39 = vadd.f32 %v1001_v50, %v1950_v56  ;;  %v1034_v32 = vadd.f32 %v1002_v20, %v1952_v26 }
 0x130   : > { %v1143_v62 = vadd.f32 %v1102_v59, %v1031_v38  ;;  %v1144_v63 = vadd.f32 %v1102_v59, %v1032_v53  ;;  %v1129_v4 = vadd.f32 %v1067_v18, %v1017_v24  ;;  %v1130_v15 = vadd.f32 %v1067_v18, %v1018_v11 }
 0x131   : > { %v1037_v1 = vadd.f32 %v1005_v52, %v1956_v33  ;;  %v1038_v5 = vadd.f32 %v1006_v27, %v1958_v12 }
 0x132   : > { %1175 = vst [vmem:[%s2003_s4 + $0xc0] sm:$0xff] %v1143_v62  ;;  %1176 = vst [vmem:[%s2003_s4 + $0xc8] sm:$0xff] %v1144_v63 }
 0x133   : > { %v1112_v8 = vpop.permute.xlu0 %1111  ;;  %1161 = vst [vmem:[%s2003_s4 + $0x50] sm:$0xff] %v1129_v4  ;;  %1162 = vst [vmem:[%s2003_s4 + $0x58] sm:$0xff] %v1130_v15  ;;  %v1077_v3 = vpop.permute.xlu1 %1076 }
 0x134   : > { %v1147_v51 = vadd.f32 %v1112_v8, %v1035_v21  ;;  %v1148_v55 = vadd.f32 %v1112_v8, %v1036_v34  ;;  %v1133_v19 = vadd.f32 %v1077_v3, %v1021_v58  ;;  %v1134_v29 = vadd.f32 %v1077_v3, %v1022_v43 }
 0x136   : > { %1179 = vst [vmem:[%s2003_s4 + $0xe0] sm:$0xff] %v1147_v51  ;;  %1180 = vst [vmem:[%s2003_s4 + $0xe8] sm:$0xff] %v1148_v55 }
 0x137   : > { %1165 = vst [vmem:[%s2003_s4 + $0x70] sm:$0xff] %v1133_v19  ;;  %1166 = vst [vmem:[%s2003_s4 + $0x78] sm:$0xff] %v1134_v29  ;;  %v1087_v46 = vpop.permute.xlu1 %1086 }
 0x138   : > { %v1137_v31 = vadd.f32 %v1087_v46, %v1025_v49  ;;  %v1138_v28 = vadd.f32 %v1087_v46, %v1026_v22 }
 0x13a   : > { %1169 = vst [vmem:[%s2003_s4 + $0x90] sm:$0xff] %v1137_v31  ;;  %1170 = vst [vmem:[%s2003_s4 + $0x98] sm:$0xff] %v1138_v28 }
 0x13b   : > { %v1097_v54 = vpop.permute.xlu1 %1096 }
 0x13c   : > { %v1141_v16 = vadd.f32 %v1097_v54, %v1029_v60  ;;  %v1142_v2 = vadd.f32 %v1097_v54, %v1030_v17 }
 0x13e   : > { %1173 = vst [vmem:[%s2003_s4 + $0xb0] sm:$0xff] %v1141_v16  ;;  %1174 = vst [vmem:[%s2003_s4 + $0xb8] sm:$0xff] %v1142_v2 }
 0x13f   : > { %v1107_v0 = vpop.permute.xlu1 %1106 }
 0x140   : > { %v1145_v30 = vadd.f32 %v1107_v0, %v1033_v39  ;;  %v1146_v36 = vadd.f32 %v1107_v0, %v1034_v32 }
 0x142   : > { %1177 = vst [vmem:[%s2003_s4 + $0xd0] sm:$0xff] %v1145_v30  ;;  %1178 = vst [vmem:[%s2003_s4 + $0xd8] sm:$0xff] %v1146_v36 }
 0x143   : > { %v1117_v25 = vpop.permute.xlu1 %1116 }
 0x144   : > { %v1149_v56 = vadd.f32 %v1117_v25, %v1037_v1  ;;  %v1150_v26 = vadd.f32 %v1117_v25, %v1038_v5 }
 0x146   : > { %1181 = vst [vmem:[%s2003_s4 + $0xf0] sm:$0xff] %v1149_v56  ;;  %1182 = vst [vmem:[%s2003_s4 + $0xf8] sm:$0xff] %v1150_v26 }
 0x147   : > { %1483 = shalt.err (!%p1480_p5)
}
 0x148   : > { %s1484_s24 = scalar_lea.hbm %s2118_s15, 4096  ;;  %s1488_s27 = scalar_lea.hbm %s2173_s2, 8192 }
 0x149   : > { %p1485_p6 = scmp.ne.s32.totalorder %s2118_s15, %s1484_s24  ;;  %p1489_p10 = scmp.lt.s32.totalorder %s2118_s15, %s2173_s2 }
 0x14a   : > { %p1490_p11 = scmp.lt.s32.totalorder %s1488_s27, %s1484_s24 }
 0x14b   : > { %p1486_p7 = pnand %p1485_p6, %p1611_p4 }
 0x14c   : > { %p1491_p12 = por %p1490_p11, %p1489_p10 }
 0x14d   : > { %p1487_p9 = pneg %p1486_p7 }
 0x14f   : > { %p1492_p13 = pnand %p1491_p12, %p1487_p9 }
 0x151   : > { %1495 = shalt.err (!%p1492_p13)
}
 0x152   : > { %s1554_s30 = smov 256   ;;  %s1555_s3 = smov 16  }
 0x153   : > { %1302 = dma.vmem_to_hbm [thread:$0]  (%p1611_p4), %s2120_s6, 4096, %s2118_s15, %s2126_s12, %s1554_s30, %s1554_s30, %s1555_s3  }
 0x154 PF: > { %p1308_p0 = scmp.ge.s32.totalorder %s1546_s14, 2  ;;  %s1215_s4 = sand.u32 1, %s1526_s9  }
 0x155   : > { %s1216_s5 = scalar_lea.sflag [#allocation3], %s1215_s4 }
 0x156   : > { %p1305_p1 = pnand %p1308_p0, %p1618_p8 }
 0x158   : > { %p1306_p2 = pneg %p1305_p1 }
 0x15a   : > { %1521 = dma.done.wait (%p1306_p2), %s1216_s5, 4096  }
 0x15b   : > { %1523 = vsyncadd (%p1306_p2), %s1216_s5, 4294963200  ;;  %s15_s14 = sadd.s32 1, %s1546_s14   ;;  %s2176_s9 = smov %s1530_s10 }
 0x15c   : > { %p12_p3 = scmp.ge.s32.totalorder %s15_s14, 4   ;;  %s2177_s10 = smov %s1534_s11 }
 0x15d   : > { %s2178_s11 = smov %s1624_s22  ;;  %s2179_s12 = smov %s1542_s13 }
 0x15e   : > { %s2180_s13 = smov %s2182_s17  ;;  %14 = sbr.rel (!%p12_p3) target bundleno = 4 (0x4), region = 66 }
 0x163   :  { %1221 = vsyncpa [#allocation3], 1 }
 0x164   :  { %1223 = vsyncpa [#allocation3 + $0x1], 1 }

</bundles_post_ra>
